<compile_context>
chip_gen: v5e
topology: v5e:2x2
jax: 0.10.0
libtpu: 0.0.40
codegen_flags: <defaults>
</compile_context>

<pallas_src>
import functools

import jax
import jax.numpy as jnp
from jax import lax
from jax.experimental import pallas as pl
from jax.experimental.pallas import tpu as pltpu


# ----------------------------- Pallas kernel ---------------------------------
def _gcn_kernel(idx_ref, x_ref, w1_ref, w2_ref, misc_ref, out_ref,
                *, n_nodes, n_edges, n_graphs, h1, h2):
    f32 = jnp.float32
    bf16 = jnp.bfloat16

    # ---- unpack the single int32 index operand ----
    dst_row = idx_ref[0:1, :n_edges]                    # (1, E)  edge targets
    batch_row = idx_ref[1:2, :n_nodes]                  # (1, N)  node -> graph id
    src_col = idx_ref[8:8 + n_edges, 0:1]               # (E, 1)  edge sources (sublane aligned)

    # ---- dense adjacency (with self loops) built on the MXU — no scatter, no .T ----
    # dt[t, e]  = 1 if dst[e] == t                      (N, E)
    # stT[e, s] = 1 if src[e] == s                      (E, N)  built directly in MXU layout
    dt = (lax.broadcasted_iota(jnp.int32, (n_nodes, n_edges), 0) == dst_row).astype(bf16)
    stT = (lax.broadcasted_iota(jnp.int32, (n_edges, n_nodes), 1) == src_col).astype(bf16)
    eye = (lax.broadcasted_iota(jnp.int32, (n_nodes, n_nodes), 0)
           == lax.broadcasted_iota(jnp.int32, (n_nodes, n_nodes), 1)).astype(f32)
    # adj[t, s] = #edges s->t (duplicates summed, like PyG) + self loop
    adj = jnp.dot(dt, stT, preferred_element_type=f32) + eye        # (N, N) f32

    # ---- symmetric normalization, materialized ONCE and reused by both layers ----
    deg = jnp.sum(adj, axis=-1, keepdims=True)                      # (N, 1)  lane reduce (XLU)
    dinv = lax.rsqrt(deg)                                           # (N, 1)  EUP; deg >= 1
    dinv_row = jnp.sum(dinv * eye, axis=0, keepdims=True)           # (1, N)  sublane reduce (XLU)
    adj_hat = ((dinv * adj) * dinv_row).astype(bf16)                # (N, N)  bf16 MXU operand

    # ---- packed small params ----
    b1 = misc_ref[0:1, :h1]                                         # (1, H1)
    b2 = misc_ref[1:2, :h2]                                         # (1, H2)
    lw_row = misc_ref[2:3, :h2]                                     # (1, H2) lin.weight, lane-dense
    lb = misc_ref[3:4, 0:1]                                         # (1, 1)  lin.bias

    # ---- GCNConv 1 + ReLU:  A_hat (X W1) + b1 ----
    h = jnp.dot(x_ref[...], w1_ref[...], preferred_element_type=f32)          # (N, H1)
    h = jnp.dot(adj_hat, h.astype(bf16), preferred_element_type=f32) + b1
    h = jnp.maximum(h, 0.0)

    # ---- GCNConv 2 + ReLU ----
    h = jnp.dot(h.astype(bf16), w2_ref[...], preferred_element_type=f32)      # (N, H2)
    h = jnp.dot(adj_hat, h.astype(bf16), preferred_element_type=f32) + b2
    h = jnp.maximum(h, 0.0)

    # ---- global_mean_pool via one-hot matmul ----
    pool_f = (lax.broadcasted_iota(jnp.int32, (n_graphs, n_nodes), 0)
              == batch_row).astype(f32)                                       # (G, N)
    counts = jnp.maximum(jnp.sum(pool_f, axis=-1, keepdims=True), 1.0)        # (G, 1)
    g = jnp.dot(pool_f.astype(bf16), h.astype(bf16),
                preferred_element_type=f32) / counts                          # (G, H2)

    # ---- final Linear (H2 -> 1): lane reduction instead of a width-1 MXU matmul ----
    # TODO(synk): make this lane-dense ((1, G) layout) when num_graphs grows.
    out_ref[...] = jnp.sum(g * lw_row, axis=-1, keepdims=True) + lb


# ----------------------------- wrapper ----------------------------------------
def pack_params(params):
    """One-time packing of the tiny parameters (amortizable across calls)."""
    w1, b1, w2, b2, lw, lb = params
    h1, h2 = w1.shape[1], w2.shape[1]
    hmax = max(h1, h2)

    def pad_row(r):
        r = jnp.asarray(r, jnp.float32).reshape(1, -1)
        return jnp.pad(r, ((0, 0), (0, hmax - r.shape[-1])))

    misc = jnp.concatenate([pad_row(b1), pad_row(b2),
                            pad_row(lw.reshape(-1)), pad_row(lb.reshape(-1))], axis=0)
    return (w1.astype(jnp.bfloat16), w2.astype(jnp.bfloat16), misc)


def pack_indices(edge_index, batch, n_nodes):
    """Pack edge_index + batch into one int32 VMEM operand.

    Row 0           : dst (lane row, length E)
    Row 1           : batch (lane row, length N)
    Rows 8 .. 8+E-1 : src in column 0 (sublane-aligned column, length E)
    """
    e = edge_index.shape[1]
    w = max(e, n_nodes)
    idx = jnp.zeros((8 + e, w), jnp.int32)
    idx = idx.at[0, :e].set(edge_index[1].astype(jnp.int32))
    idx = idx.at[1, :n_nodes].set(batch.astype(jnp.int32))
    idx = idx.at[8:8 + e, 0].set(edge_index[0].astype(jnp.int32))
    return idx


def my_gcn_forward(x, edge_index, batch, params, num_graphs):
    """Fused dense-formulation forward pass of MyGCN as a single Pallas kernel."""
    n, c_in = x.shape
    e = edge_index.shape[1]
    w1, w2, misc = pack_params(params)
    h1, h2 = w1.shape[1], w2.shape[1]

    idx = pack_indices(edge_index, batch, n)
    x_bf = x.astype(jnp.bfloat16)

    vmem = pl.BlockSpec(memory_space=pltpu.MemorySpace.VMEM)

    kernel = functools.partial(_gcn_kernel, n_nodes=n, n_edges=e,
                               n_graphs=num_graphs, h1=h1, h2=h2)

    flops = 2 * (n * e * n          # adjacency build (dt @ stT)
                 + n * c_in * h1    # X @ W1
                 + n * n * h1       # propagation, layer 1
                 + n * h1 * h2      # H @ W2
                 + n * n * h2       # propagation, layer 2
                 + num_graphs * n * h2   # mean pool
                 + num_graphs * h2)      # output head
    bytes_accessed = (idx.size * 4 + x_bf.size * 2 + w1.size * 2 + w2.size * 2
                      + misc.size * 4 + num_graphs * 4)
    cost = pl.CostEstimate(flops=flops, transcendentals=n,
                           bytes_accessed=bytes_accessed)

    out = pl.pallas_call(
        kernel,
        out_shape=jax.ShapeDtypeStruct((num_graphs, 1), jnp.float32),
        in_specs=[vmem, vmem, vmem, vmem, vmem],
        out_specs=vmem,
        cost_estimate=cost,
        compiler_params=pltpu.CompilerParams(vmem_limit_bytes=32 * 1024 * 1024),
    )(idx, x_bf, w1, w2, misc)
    return out


# ----------------------------- driver ------------------------------------------
if __name__ == "__main__":
    # input_channels = 4, mp_layers = [32, 32], 2 graphs of 8 nodes each (N = 16).
    N, C_IN, H1, H2, G = 16, 4, 32, 32, 2

    key = jax.random.PRNGKey(0)
    k_x, k_w1, k_b1, k_w2, k_b2, k_lw, k_lb = jax.random.split(key, 7)

    x = jax.random.normal(k_x, (N, C_IN), dtype=jnp.float32)

    # Two undirected ring graphs: nodes 0-7 and 8-15.
    edges = []
    for gidx in range(G):
        base = gidx * 8
        for i in range(8):
            s, t = base + i, base + (i + 1) % 8
            edges.append((s, t))
            edges.append((t, s))
    edge_index = jnp.array(edges, dtype=jnp.int32).T          # (2, 32)
    batch = jnp.array([0] * 8 + [1] * 8, dtype=jnp.int32)     # (16,)

    w1 = jax.random.normal(k_w1, (C_IN, H1), dtype=jnp.float32) * 0.1
    b1 = jax.random.normal(k_b1, (1, H1), dtype=jnp.float32) * 0.1
    w2 = jax.random.normal(k_w2, (H1, H2), dtype=jnp.float32) * 0.1
    b2 = jax.random.normal(k_b2, (1, H2), dtype=jnp.float32) * 0.1
    lw = jax.random.normal(k_lw, (H2, 1), dtype=jnp.float32) * 0.1
    lb = jax.random.normal(k_lb, (1, 1), dtype=jnp.float32) * 0.1
    params = (w1, b1, w2, b2, lw, lb)

    out = jax.block_until_ready(my_gcn_forward(x, edge_index, batch, params, G))

    # Pure-JAX f32 reference (duplicate edges summed, like PyG GCNConv).
    adj = jnp.zeros((N, N), jnp.float32).at[edge_index[1], edge_index[0]].add(1.0) + jnp.eye(N)
    dinv = 1.0 / jnp.sqrt(adj.sum(axis=1))
    A = dinv[:, None] * adj * dinv[None, :]
    h = jnp.maximum(A @ (x @ w1) + b1, 0.0)
    h = jnp.maximum(A @ (h @ w2) + b2, 0.0)
    one_hot = (batch[None, :] == jnp.arange(G)[:, None]).astype(jnp.float32)
    ref = (one_hot / one_hot.sum(1, keepdims=True)) @ h @ lw + lb

    assert out.shape == (G, 1)
    # bf16 MXU operands (f32 accumulation) -> slightly looser tolerance vs the f32 reference.
    assert jnp.allclose(out, ref, atol=2e-2, rtol=2e-2), (out, ref)
    print("KERNEL_OK")
</pallas_src>

<mosaic_0001>
module attributes {stable_mosaic.version = 11 : i64} {
  func.func @_gcn_kernel(%arg0: memref<40x32xi32, #tpu.memory_space<vmem>>, %arg1: memref<16x4xbf16, #tpu.memory_space<vmem>>, %arg2: memref<4x32xbf16, #tpu.memory_space<vmem>>, %arg3: memref<32x32xbf16, #tpu.memory_space<vmem>>, %arg4: memref<4x32xf32, #tpu.memory_space<vmem>>, %arg5: memref<2x1xf32, #tpu.memory_space<vmem>>) attributes {dimension_semantics = [], scalar_prefetch = 0 : i64, scratch_operands = 0 : i64, tpu.core_type = #tpu.core_type<tc>} {
    %c0 = arith.constant 0 : index
    %c0_0 = arith.constant 0 : index
    %0 = vector.load %arg0[%c0, %c0_0] : memref<40x32xi32, #tpu.memory_space<vmem>>, vector<1x32xi32>
    %c1 = arith.constant 1 : index
    %c0_1 = arith.constant 0 : index
    %1 = vector.load %arg0[%c1, %c0_1] : memref<40x32xi32, #tpu.memory_space<vmem>>, vector<1x16xi32>
    %c8 = arith.constant 8 : index
    %c0_2 = arith.constant 0 : index
    %2 = vector.load %arg0[%c8, %c0_2] : memref<40x32xi32, #tpu.memory_space<vmem>>, vector<32x1xi32>
    %3 = tpu.iota {dimensions = array<i32: 0>} : vector<16x32xi32>
    %4 = vector.broadcast %0 : vector<1x32xi32> to vector<16x32xi32>
    %5 = arith.cmpi eq, %3, %4 : vector<16x32xi32>
    %6 = arith.extui %5 : vector<16x32xi1> to vector<16x32xi32>
    %7 = arith.sitofp %6 : vector<16x32xi32> to vector<16x32xf32>
    %8 = arith.truncf %7 : vector<16x32xf32> to vector<16x32xbf16>
    %9 = tpu.iota {dimensions = array<i32: 1>} : vector<32x16xi32>
    %10 = vector.broadcast %2 : vector<32x1xi32> to vector<32x16xi32>
    %11 = arith.cmpi eq, %9, %10 : vector<32x16xi32>
    %12 = arith.extui %11 : vector<32x16xi1> to vector<32x16xi32>
    %13 = arith.sitofp %12 : vector<32x16xi32> to vector<32x16xf32>
    %14 = arith.truncf %13 : vector<32x16xf32> to vector<32x16xbf16>
    %15 = tpu.iota {dimensions = array<i32: 0>} : vector<16x16xi32>
    %16 = tpu.iota {dimensions = array<i32: 1>} : vector<16x16xi32>
    %17 = arith.cmpi eq, %15, %16 : vector<16x16xi32>
    %18 = arith.extui %17 : vector<16x16xi1> to vector<16x16xi32>
    %19 = arith.sitofp %18 : vector<16x16xi32> to vector<16x16xf32>
    %cst = arith.constant dense<0.000000e+00> : vector<16x16xf32>
    %20 = tpu.matmul %8, %14, %cst {dimension_numbers = #tpu.dot_dimension_numbers<[1], [0], [0], [1], [0, 0, 1, 1], [], []>} : vector<16x32xbf16>, vector<32x16xbf16>, vector<16x16xf32> -> vector<16x16xf32>
    %21 = arith.addf %20, %19 : vector<16x16xf32>
    %cst_3 = arith.constant dense<0.000000e+00> : vector<16xf32>
    %22 = vector.multi_reduction <add>, %21, %cst_3 [1] : vector<16x16xf32> to vector<16xf32>
    %23 = vector.shape_cast %22 : vector<16xf32> to vector<16x1xf32>
    %24 = math.rsqrt %23 : vector<16x1xf32>
    %25 = vector.broadcast %24 : vector<16x1xf32> to vector<16x16xf32>
    %26 = arith.mulf %25, %19 : vector<16x16xf32>
    %cst_4 = arith.constant dense<0.000000e+00> : vector<16xf32>
    %27 = vector.multi_reduction <add>, %26, %cst_4 [0] : vector<16x16xf32> to vector<16xf32>
    %28 = vector.shape_cast %27 : vector<16xf32> to vector<1x16xf32>
    %29 = vector.broadcast %24 : vector<16x1xf32> to vector<16x16xf32>
    %30 = arith.mulf %29, %21 : vector<16x16xf32>
    %31 = vector.broadcast %28 : vector<1x16xf32> to vector<16x16xf32>
    %32 = arith.mulf %30, %31 : vector<16x16xf32>
    %33 = arith.truncf %32 : vector<16x16xf32> to vector<16x16xbf16>
    %c0_5 = arith.constant 0 : index
    %c0_6 = arith.constant 0 : index
    %34 = vector.load %arg4[%c0_5, %c0_6] : memref<4x32xf32, #tpu.memory_space<vmem>>, vector<1x32xf32>
    %c1_7 = arith.constant 1 : index
    %c0_8 = arith.constant 0 : index
    %35 = vector.load %arg4[%c1_7, %c0_8] : memref<4x32xf32, #tpu.memory_space<vmem>>, vector<1x32xf32>
    %c2 = arith.constant 2 : index
    %c0_9 = arith.constant 0 : index
    %36 = vector.load %arg4[%c2, %c0_9] : memref<4x32xf32, #tpu.memory_space<vmem>>, vector<1x32xf32>
    %c3 = arith.constant 3 : index
    %c0_10 = arith.constant 0 : index
    %37 = vector.load %arg4[%c3, %c0_10] : memref<4x32xf32, #tpu.memory_space<vmem>>, vector<1x1xf32>
    %c0_11 = arith.constant 0 : index
    %c0_12 = arith.constant 0 : index
    %38 = vector.load %arg1[%c0_11, %c0_12] : memref<16x4xbf16, #tpu.memory_space<vmem>>, vector<16x4xbf16>
    %c0_13 = arith.constant 0 : index
    %c0_14 = arith.constant 0 : index
    %39 = vector.load %arg2[%c0_13, %c0_14] : memref<4x32xbf16, #tpu.memory_space<vmem>>, vector<4x32xbf16>
    %cst_15 = arith.constant dense<0.000000e+00> : vector<16x32xf32>
    %40 = tpu.matmul %38, %39, %cst_15 {dimension_numbers = #tpu.dot_dimension_numbers<[1], [0], [0], [1], [0, 0, 1, 1], [], []>} : vector<16x4xbf16>, vector<4x32xbf16>, vector<16x32xf32> -> vector<16x32xf32>
    %41 = arith.truncf %40 : vector<16x32xf32> to vector<16x32xbf16>
    %cst_16 = arith.constant dense<0.000000e+00> : vector<16x32xf32>
    %42 = tpu.matmul %33, %41, %cst_16 {dimension_numbers = #tpu.dot_dimension_numbers<[1], [0], [0], [1], [0, 0, 1, 1], [], []>} : vector<16x16xbf16>, vector<16x32xbf16>, vector<16x32xf32> -> vector<16x32xf32>
    %43 = vector.broadcast %34 : vector<1x32xf32> to vector<16x32xf32>
    %44 = arith.addf %42, %43 : vector<16x32xf32>
    %cst_17 = arith.constant 0.000000e+00 : f32
    %45 = vector.broadcast %cst_17 : f32 to vector<16x32xf32>
    %46 = arith.maximumf %44, %45 : vector<16x32xf32>
    %47 = arith.truncf %46 : vector<16x32xf32> to vector<16x32xbf16>
    %c0_18 = arith.constant 0 : index
    %c0_19 = arith.constant 0 : index
    %48 = vector.load %arg3[%c0_18, %c0_19] : memref<32x32xbf16, #tpu.memory_space<vmem>>, vector<32x32xbf16>
    %cst_20 = arith.constant dense<0.000000e+00> : vector<16x32xf32>
    %49 = tpu.matmul %47, %48, %cst_20 {dimension_numbers = #tpu.dot_dimension_numbers<[1], [0], [0], [1], [0, 0, 1, 1], [], []>} : vector<16x32xbf16>, vector<32x32xbf16>, vector<16x32xf32> -> vector<16x32xf32>
    %50 = arith.truncf %49 : vector<16x32xf32> to vector<16x32xbf16>
    %cst_21 = arith.constant dense<0.000000e+00> : vector<16x32xf32>
    %51 = tpu.matmul %33, %50, %cst_21 {dimension_numbers = #tpu.dot_dimension_numbers<[1], [0], [0], [1], [0, 0, 1, 1], [], []>} : vector<16x16xbf16>, vector<16x32xbf16>, vector<16x32xf32> -> vector<16x32xf32>
    %52 = vector.broadcast %35 : vector<1x32xf32> to vector<16x32xf32>
    %53 = arith.addf %51, %52 : vector<16x32xf32>
    %cst_22 = arith.constant 0.000000e+00 : f32
    %54 = vector.broadcast %cst_22 : f32 to vector<16x32xf32>
    %55 = arith.maximumf %53, %54 : vector<16x32xf32>
    %56 = tpu.iota {dimensions = array<i32: 0>} : vector<2x16xi32>
    %57 = vector.broadcast %1 : vector<1x16xi32> to vector<2x16xi32>
    %58 = arith.cmpi eq, %56, %57 : vector<2x16xi32>
    %59 = arith.extui %58 : vector<2x16xi1> to vector<2x16xi32>
    %60 = arith.sitofp %59 : vector<2x16xi32> to vector<2x16xf32>
    %cst_23 = arith.constant dense<0.000000e+00> : vector<2xf32>
    %61 = vector.multi_reduction <add>, %60, %cst_23 [1] : vector<2x16xf32> to vector<2xf32>
    %62 = vector.shape_cast %61 : vector<2xf32> to vector<2x1xf32>
    %cst_24 = arith.constant 1.000000e+00 : f32
    %63 = vector.broadcast %cst_24 : f32 to vector<2x1xf32>
    %64 = arith.maximumf %62, %63 : vector<2x1xf32>
    %65 = arith.truncf %60 : vector<2x16xf32> to vector<2x16xbf16>
    %66 = arith.truncf %55 : vector<16x32xf32> to vector<16x32xbf16>
    %cst_25 = arith.constant dense<0.000000e+00> : vector<2x32xf32>
    %67 = tpu.matmul %65, %66, %cst_25 {dimension_numbers = #tpu.dot_dimension_numbers<[1], [0], [0], [1], [0, 0, 1, 1], [], []>} : vector<2x16xbf16>, vector<16x32xbf16>, vector<2x32xf32> -> vector<2x32xf32>
    %68 = vector.broadcast %64 : vector<2x1xf32> to vector<2x32xf32>
    %69 = arith.divf %67, %68 : vector<2x32xf32>
    %70 = vector.broadcast %36 : vector<1x32xf32> to vector<2x32xf32>
    %71 = arith.mulf %69, %70 : vector<2x32xf32>
    %cst_26 = arith.constant dense<0.000000e+00> : vector<2xf32>
    %72 = vector.multi_reduction <add>, %71, %cst_26 [1] : vector<2x32xf32> to vector<2xf32>
    %73 = vector.shape_cast %72 : vector<2xf32> to vector<2x1xf32>
    %74 = vector.broadcast %37 : vector<1x1xf32> to vector<2x1xf32>
    %75 = arith.addf %73, %74 : vector<2x1xf32>
    %c0_27 = arith.constant 0 : index
    %c0_28 = arith.constant 0 : index
    %76 = vector.load %arg5[%c0_27, %c0_28] : memref<2x1xf32, #tpu.memory_space<vmem>>, vector<2x1xf32>
    tpu.vector_store %arg5[%c0_27, %c0_28], %75 {strides = array<i32>} : memref<2x1xf32, #tpu.memory_space<vmem>>, vector<2x1xf32>,
    return
  }
}

</mosaic_0001>

<bundles_post_ra>
// kernel: tpu_custom_call.1
= control target key start
LH: loop header
LB: loop body
LE: loop exit
PB: predicated region body
PF: predicated region fallthrough
CT: control target
= control target key end

     0   :  { %v347_v0 = vmov 0   ;;  %v27_v5 = vlaneseq  ;;  %v348_v14 = vmov 1.0|1.0   ;;  %v349_v15 = vmov 0.0   ;;  %s445_s0 = inlined_call_operand.vmem [shape: s32[40,32], index: 0, kind: input, shape index: {}]   ;;  %s446_s2 = inlined_call_operand.vmem [shape: bf16[4,32], index: 2, kind: input, shape index: {}]   ;;  %s447_s1 = inlined_call_operand.vmem [shape: bf16[16,4], index: 1, kind: input, shape index: {}]   ;;  %s448_s4 = inlined_call_operand.vmem [shape: f32[4,32], index: 4, kind: input, shape index: {}]   ;;  %s449_s3 = inlined_call_operand.vmem [shape: bf16[32,32], index: 3, kind: input, shape index: {}]   ;;  %s450_s5 = inlined_call_operand.vmem [shape: f32[2,1], index: 5, kind: output, shape index: {}]  }
   0x1   :  { %334 = vset.pattern.permute.xlu1 %v347_v0  ;;  %333 = vset.pattern.permute.xlu0 %v347_v0  ;;  %v25_v1 = vld [vmem:[%s445_s0 + $0x18] sm:$0xff]  ;;  %v23_v2 = vld [vmem:[%s445_s0 + $0x8] sm:$0xff]  ;;  %v26_v3 = vld [vmem:[%s445_s0 + $0x20] sm:$0xff]  ;;  %vm72_vm8 = vcmask 261120   ;;  %vm149_vm9 = vcmask 1041408   ;;  %vm145_vm10 = vcmask 31744  }
   0x2   :  { %47 = vperm.xlu0 %333, %v25_v1   ;;  %41 = vperm.xlu1 %334, %v23_v2   ;;  %v24_v4 = vld [vmem:[%s445_s0 + $0x10] sm:$0xff]  ;;  %v392_v8 = vshrl.u32 %v27_v5, 7  ;;  %v335_v10 = vld [vmem:[%s445_s0] ss:$0 sm:$0xff]  ;;  %v39_v11 = vand.u32 127, %v27_v5  ;;  %vm90_vm12 = vcmask 130048  }
   0x3   :  { %v139_v19 = vld [vmem:[%s446_s2] sm:$0x3]  ;;  %v329_v1 = vld [vmem:[%s449_s3 + $0x8] sm:$0xff] }
   0x4   :  { %v29_v9 = vadd.s32 8, %v392_v8  ;;  %vm31_vm1 = vcmp.eq.s32.totalorder %v392_v8, %v335_v10  ;;  %v151_v20 = vsel %vm149_vm9, %v139_v19, 0  ;;  %v327_v21 = vld [vmem:[%s447_s1] sm:$0xff]  ;;  %vm66_vm11 = vcmp.eq.s32.totalorder %v392_v8, %v39_v11  ;;  %214 = vmatpush.bf16.msra.mxu3 %v329_v1 }
   0x5   :  { %v296_v16 = vsel %vm31_vm1, 1.0, %v349_v15  ;;  %160 = vmatpush.bf16.msra.mxu1 %v151_v20  ;;  %v302_v22 = vsel %vm66_vm11, 1.0, %v349_v15  ;;  %v328_v2 = vld [vmem:[%s449_s3] sm:$0xff]  ;;  %vm290_vm11 = vcmask 1024  }
   0x6   :  { %vm32_vm2 = vcmp.eq.s32.totalorder %v29_v9, %v335_v10  ;;  %vm67_vm13 = vcmp.eq.s32.totalorder %v29_v9, %v39_v11  ;;  %v337_v20 = vld [vmem:[%s448_s4 + $0x1] ss:$0 sm:$0xff] }
   0x7   :  { %v297_v17 = vsel %vm32_vm2, 1.0, %v349_v15  ;;  %v303_v26 = vsel %vm67_vm13, 1.0, %v349_v15 }
   0x8   :  { %v37_v18 = vpack.c.bf16 %v297_v17, %v296_v16  ;;  %313 = vmatmul.msk.bf16.vlgmr.msra.gmra.mxu1 %vm145_vm10, %v327_v21  ;;  %215 = vmatpush.bf16.msra.mxu3 %v328_v2  ;;  %v338_v16 = vld [vmem:[%s445_s0 + $0x1] ss:$0 sm:$0xff]  ;;  %vm284_vm10 = vcmask 254976  }
   0xa   :  { %50 = vperm.xlu0 %333, %v26_v3   ;;  %44 = vperm.xlu1 %334, %v24_v4   ;;  %v336_v4 = vld [vmem:[%s448_s4] ss:$0 sm:$0xff] }
  0x74   :  { %v48_v6 = vpop.permute.xlu0 %47  ;;  %v42_v7 = vpop.permute.xlu1 %41 }
  0x75   :  { %vm54_vm3 = vcmp.eq.s32.totalorder %v39_v11, %v48_v6  ;;  %vm52_vm6 = vcmp.eq.s32.totalorder %v39_v11, %v42_v7 }
  0x7c   :  { %v51_v12 = vpop.permute.xlu0 %50  ;;  %v45_v13 = vpop.permute.xlu1 %44 }
  0x7d   :  { %vm55_vm0 = vcmp.eq.s32.totalorder %v39_v11, %v51_v12  ;;  %vm53_vm5 = vcmp.eq.s32.totalorder %v39_v11, %v45_v13 }
  0x7e   :  { %vm304_vm4 = vmpackc.low %vm55_vm0, %vm54_vm3 }
  0x7f   :  { %305 = vmatpush.bf16.msk.msra.mxu0 %vm304_vm4, %v348_v14  ;;  %vm306_vm7 = vmpackc.low %vm53_vm5, %vm52_vm6  ;;  %vm241_vm4 = vcmp.eq.s32.totalorder %v392_v8, %v338_v16  ;;  %vm244_vm5 = vcmask 123904  }
  0x80   :  { %v325_v17 = vsel %vm241_vm4, 1.0, %v349_v15 }
  0x83   :  { %307 = vmatpush.bf16.msk.msra.mxu0 %vm306_vm7, %v348_v14 }
  0x85   :  { %v162_v30 = vpop.f32.mrf.mxu1 }
  0x86   :  { %308 = vmatmul.msk.bf16.vlgmr.msra.gmra.mxu0 %vm72_vm8, %v37_v18  ;;  %v245_v18 = vsel %vm244_vm5, %v325_v17, 0.0 }
  0x87   :  { %246 = vadd.xlane.f32.xlu0 %v245_v18 }
  0x8d   :  { %v164_v32 = vpop.f32.mrf.mxu1 }
  0x8e   :  { %v167_v33 = vpack.c.bf16 %v164_v32, %v162_v30 }
  0x90   :  { %179 = vmatpush.bf16.msra.mxu2 %v167_v33 }
  0xfa   :  { %v247_v8 = vpop.xlane.xlu0 %246 }
  0xfb   :  { %v248_v15 = vmax.f32 %v247_v8, 1.0 }
  0xfd   :  { %vm272_vm6 = vweird.f32 %v248_v15  ;;  %v278_v32 = vand.u32 2147483648, %v248_v15 }
 0x103   :  { %v85_v23 = vpop.f32.mrf.mxu0 }
 0x104   :  { %v86_v24 = vadd.f32 %v302_v22, %v85_v23 }
 0x106   :  { %v91_v25 = vsel %vm90_vm12, %v86_v24, 0.0 }
 0x107   :  { %92 = vadd.xlane.f32.xlu2 %v91_v25 }
 0x10b   :  { %v87_v27 = vpop.f32.mrf.mxu0 }
 0x10c   :  { %v88_v28 = vadd.f32 %v303_v26, %v87_v27  ;;  %v249_v27 = vpack.c.bf16 %v325_v17, %v325_v17 }
 0x10e   :  { %v94_v29 = vsel %vm90_vm12, %v88_v28, 0.0 }
 0x10f   :  { %95 = vadd.xlane.f32.xlu2 %v94_v29 }
 0x17a   :  { %v93_v31 = vpop.xlane.xlu2 %92 }
 0x17b   :  { %341 = vrsqrt.f32 %v93_v31  ;;  %vm103_vm15 = vweird.f32 %v93_v31 }
 0x181   :  { %v342_v34 = vpop.eup %341 }
 0x182   :  { %v98_v35 = vmul.f32 %v342_v34, %v93_v31  ;;  %v96_v36 = vpop.xlane.xlu2 %95  ;;  %vm104_vm14 = vweird.f32 %v342_v34 }
 0x183   :  { %343 = vrsqrt.f32 %v96_v36  ;;  %vm105_vm0 = vmor %vm103_vm15, %vm104_vm14  ;;  %vm113_vm2 = vweird.f32 %v96_v36 }
 0x184   :  { %v99_v37 = vmul.f32 %v342_v34, %v98_v35  ;;  %345 = vrcp.f32 %v248_v15  ;;  %v279_v35 = vor.u32 1.1754944e-38, %v278_v32 }
 0x186   :  { %v100_v38 = vmul.f32 0.5, %v99_v37  ;;  %v339_v37 = vld [vmem:[%s448_s4 + $0x2] ss:$0 sm:$0xff] }
 0x188   :  { %v101_v39 = vsub.f32 1.5, %v100_v38 }
 0x189   :  { %v344_v40 = vpop.eup %343 }
 0x18a   :  { %v108_v41 = vmul.f32 %v344_v40, %v96_v36  ;;  %v102_v42 = vmul.f32 %v342_v34, %v101_v39  ;;  %vm114_vm1 = vweird.f32 %v344_v40 }
 0x18b   :  { %vm115_vm3 = vmor %vm113_vm2, %vm114_vm1 }
 0x18c   :  { %v109_v43 = vmul.f32 %v344_v40, %v108_v41  ;;  %v106_v45 = vsel %vm105_vm0, %v342_v34, %v102_v42  ;;  %v276_v34 = vand.u32 2147483647, %v248_v15 }
 0x18d   :  { %v117_v48 = vmul.f32 %v302_v22, %v106_v45  ;;  %v128_v59 = vmul.f32 %v106_v45, %v86_v24 }
 0x18e   :  { %v110_v44 = vmul.f32 0.5, %v109_v43  ;;  %vm277_vm9 = vcmp.eq.f32.partialorder %v276_v34, 8.507059e+37 }
 0x18f   :  { %v119_v51 = vsel %vm90_vm12, %v117_v48, 0.0 }
 0x190   :  { %v111_v46 = vsub.f32 1.5, %v110_v44  ;;  %v340_v44 = vld [vmem:[%s448_s4 + $0x3] ss:$0 sm:$0xff] }
 0x192   :  { %v112_v47 = vmul.f32 %v344_v40, %v111_v46 }
 0x194   :  { %v116_v49 = vsel %vm115_vm3, %v344_v40, %v112_v47 }
 0x195   :  { %v118_v50 = vmul.f32 %v303_v26, %v116_v49  ;;  %v129_v60 = vmul.f32 %v116_v49, %v88_v28  ;;  %v346_v28 = vpop.eup %345 }
 0x196   :  { %v268_v29 = vmul.f32 %v346_v28, %v248_v15  ;;  %vm273_vm7 = vweird.f32 %v346_v28 }
 0x197   :  { %v120_v52 = vsel %vm90_vm12, %v118_v50, 0.0 }
 0x198   :  { %v121_v53 = vadd.f32 %v120_v52, %v119_v51  ;;  %v269_v30 = vsub.f32 1.0, %v268_v29 }
 0x19a   :  { %v122_v54 = vrot.slane %v121_v53, 4  ;;  %v270_v31 = vmul.f32 %v346_v28, %v269_v30 }
 0x19c   :  { %v123_v55 = vadd.f32 %v122_v54, %v121_v53  ;;  %v271_v33 = vadd.f32 %v346_v28, %v270_v31 }
 0x19e   :  { %v124_v56 = vrot.slane %v123_v55, 2 }
 0x1a0   :  { %v125_v57 = vadd.f32 %v124_v56, %v123_v55 }
 0x1a2   :  { %v126_v58 = vrot.slane %v125_v57, 1 }
 0x1a4   :  { %v127_v61 = vadd.f32 %v126_v58, %v125_v57 }
 0x1a6   :  { %v130_v62 = vmul.f32 %v128_v59, %v127_v61  ;;  %v131_v63 = vmul.f32 %v129_v60, %v127_v61 }
 0x1a8   :  { %v132_v0 = vpack.c.bf16 %v131_v63, %v130_v62 }
 0x1aa   :  { %314 = vmatmul.msk.bf16.vlgmr.msra.gmra.mxu2 %vm90_vm12, %v132_v0 }
 0x22d   :  { %v181_v3 = vpop.f32.mrf.mxu2 }
 0x22e   :  { %v182_v5 = vadd.f32 %v336_v4, %v181_v3 }
 0x230   :  { %v186_v9 = vmax.f32 %v182_v5, 0.0 }
 0x235   :  { %v183_v6 = vpop.f32.mrf.mxu2 }
 0x236   :  { %v184_v7 = vadd.f32 %v336_v4, %v183_v6 }
 0x238   :  { %v187_v10 = vmax.f32 %v184_v7, 0.0 }
 0x23a   :  { %v188_v11 = vpack.c.bf16 %v187_v10, %v186_v9 }
 0x23c   :  { %323 = vmatmul.msk.bf16.vlgmr.msra.gmra.mxu3 %vm72_vm8, %v188_v11  ;;  %vm274_vm8 = vmor %vm272_vm6, %vm273_vm7 }
 0x23d   :  { %v275_v36 = vsel %vm274_vm8, %v346_v28, %v271_v33 }
 0x23e   :  { %v280_v39 = vsel %vm277_vm9, %v279_v35, %v275_v36 }
 0x2bf   :  { %v217_v12 = vpop.f32.mrf.mxu3 }
 0x2c7   :  { %v219_v13 = vpop.f32.mrf.mxu3 }
 0x2c8   :  { %v222_v14 = vpack.c.bf16 %v219_v13, %v217_v12 }
 0x2ca   :  { %231 = vmatpush.bf16.msrb.mxu1 %v222_v14 }
 0x2cd   :  { %324 = vmatmul.msk.bf16.vlgmr.msrb.gmra.mxu1 %vm90_vm12, %v132_v0 }
 0x34a   :  { %v233_v19 = vpop.f32.mrf.mxu1 }
 0x34b   :  { %v234_v21 = vadd.f32 %v337_v20, %v233_v19 }
 0x34d   :  { %v238_v24 = vmax.f32 %v234_v21, 0.0 }
 0x352   :  { %v235_v22 = vpop.f32.mrf.mxu1 }
 0x353   :  { %v236_v23 = vadd.f32 %v337_v20, %v235_v22 }
 0x355   :  { %v239_v25 = vmax.f32 %v236_v23, 0.0 }
 0x357   :  { %v250_v26 = vpack.c.bf16 %v239_v25, %v238_v24 }
 0x359   :  { %261 = vmatpush.bf16.msrb.mxu2 %v250_v26 }
 0x35c   :  { %326 = vmatmul.msk.bf16.vlgmr.msrb.gmra.mxu2 %vm90_vm12, %v249_v27 }
 0x3df   :  { %v263_v38 = vpop.f32.mrf.mxu2 }
 0x3e0   :  { %v281_v40 = vmul.f32 %v280_v39, %v263_v38 }
 0x3e2   :  { %v283_v41 = vmul.f32 %v339_v37, %v281_v40 }
 0x3e4   :  { %v285_v42 = vsel %vm284_vm10, %v283_v41, 0.0 }
 0x3e5   :  { %286 = vadd.xlane.f32.xlu1 %v285_v42 }
 0x3e7   :  { %v265_v43 = vpop.f32.mrf.mxu2 }
 0x458   :  { %v287_v45 = vpop.xlane.xlu1 %286 }
 0x459   :  { %v289_v46 = vadd.f32 %v340_v44, %v287_v45 }
 0x45b   :  { %291 = vst.msk [vmem:[%s450_s5] sm:$0x3] %vm290_vm11, %v289_v46 }

</bundles_post_ra>
